<compile_context>
chip_gen: v7x
topology: tpu7x:2x2x1
jax: 0.10.0
libtpu: 0.0.40
codegen_flags: <defaults>
</compile_context>

<pallas_src>
import functools

import jax
import jax.numpy as jnp
from jax.experimental import pallas as pl
from jax.experimental.pallas import tpu as pltpu

_MAX_COLS = 2048                       # target lane-dim of the 2-D view
_TARGET_BLOCK_ELEMS = 256 * 1024       # ~1 MiB f32 per input block
_VMEM_LIMIT_BYTES = 32 * 1024 * 1024   # safe on v5e (128 MiB) / v6e (128) / v7x (64)


# --------------------------------------------------------------------------
# Shape planning (all free, metadata-only reshapes)
# --------------------------------------------------------------------------
def _to_2d(x):
    """Collapse contiguous trailing dims into a lane axis (free reshape)."""
    if x.ndim == 0:
        return x.reshape(1, 1)
    shape = x.shape
    cols = shape[-1]
    for d in reversed(shape[:-1]):
        if cols * d <= _MAX_COLS:
            cols *= d
        else:
            break
    if cols > _MAX_COLS:
        # Huge innermost dim: split it (still a free reshape) if 128 divides it.
        c = _MAX_COLS
        while c >= 128 and cols % c != 0:
            c //= 2
        if c >= 128:
            cols = c
    rows = x.size // cols
    return x.reshape(rows, cols)


def _plan(rows, cols):
    """Row-block size: multiple of 8 (or the full row extent), ~1 MiB f32."""
    br = max(8, (_TARGET_BLOCK_ELEMS // max(cols, 1)) // 8 * 8)
    if br >= rows:
        br = rows
    grid = -(-rows // br)
    needs_edge_mask = (grid * br != rows)
    return br, grid, needs_edge_mask


# --------------------------------------------------------------------------
# Kernels: per-block partial sums (no carried state -> "parallel" grid)
# --------------------------------------------------------------------------
def _masked_kernel(pred_ref, true_ref, mask_ref, sq_ref, cnt_ref, *,
                   rows, block_rows, needs_edge_mask):
    p = pred_ref[...].astype(jnp.float32)
    t = true_ref[...].astype(jnp.float32)
    m = mask_ref[...].astype(jnp.float32)
    if needs_edge_mask:
        row_ids = (jax.lax.broadcasted_iota(jnp.int32, p.shape, 0)
                   + pl.program_id(0) * block_rows)
        valid = row_ids < rows
        m = jnp.where(valid, m, 0.0)
        # select (not multiply) so undefined OOB values (NaN/Inf) cannot leak.
        r = jnp.where(valid, (p - t) * m, 0.0)
    else:
        r = (p - t) * m
    sq_ref[...] = jnp.broadcast_to(jnp.sum(r * r), sq_ref.shape)
    cnt_ref[...] = jnp.broadcast_to(jnp.sum(m), cnt_ref.shape)


def _unmasked_kernel(pred_ref, true_ref, sq_ref, *,
                     rows, block_rows, needs_edge_mask):
    p = pred_ref[...].astype(jnp.float32)
    t = true_ref[...].astype(jnp.float32)
    d = p - t
    if needs_edge_mask:
        row_ids = (jax.lax.broadcasted_iota(jnp.int32, p.shape, 0)
                   + pl.program_id(0) * block_rows)
        d = jnp.where(row_ids < rows, d, 0.0)
    sq_ref[...] = jnp.broadcast_to(jnp.sum(d * d), sq_ref.shape)


# --------------------------------------------------------------------------
# pallas_call wrappers
# --------------------------------------------------------------------------
@jax.jit
def _masked_partial_sums(pred2d, true2d, mask2d):
    rows, cols = pred2d.shape
    block_rows, grid, needs_edge_mask = _plan(rows, cols)
    in_spec = pl.BlockSpec((block_rows, cols), lambda i: (i, 0))
    out_spec = pl.BlockSpec((1, 8, 128), lambda i: (i, 0, 0))
    kernel = functools.partial(_masked_kernel, rows=rows,
                               block_rows=block_rows,
                               needs_edge_mask=needs_edge_mask)
    sq_p, cnt_p = pl.pallas_call(
        kernel,
        grid=(grid,),
        in_specs=[in_spec, in_spec, in_spec],
        out_specs=(out_spec, out_spec),
        out_shape=(jax.ShapeDtypeStruct((grid, 8, 128), jnp.float32),
                   jax.ShapeDtypeStruct((grid, 8, 128), jnp.float32)),
        compiler_params=pltpu.CompilerParams(
            dimension_semantics=("parallel",),
            vmem_limit_bytes=_VMEM_LIMIT_BYTES),
    )(pred2d, true2d, mask2d)
    return jnp.sum(sq_p[:, 0, 0]), jnp.sum(cnt_p[:, 0, 0])


@jax.jit
def _unmasked_partial_sum(pred2d, true2d):
    rows, cols = pred2d.shape
    block_rows, grid, needs_edge_mask = _plan(rows, cols)
    in_spec = pl.BlockSpec((block_rows, cols), lambda i: (i, 0))
    out_spec = pl.BlockSpec((1, 8, 128), lambda i: (i, 0, 0))
    kernel = functools.partial(_unmasked_kernel, rows=rows,
                               block_rows=block_rows,
                               needs_edge_mask=needs_edge_mask)
    sq_p = pl.pallas_call(
        kernel,
        grid=(grid,),
        in_specs=[in_spec, in_spec],
        out_specs=out_spec,
        out_shape=jax.ShapeDtypeStruct((grid, 8, 128), jnp.float32),
        compiler_params=pltpu.CompilerParams(
            dimension_semantics=("parallel",),
            vmem_limit_bytes=_VMEM_LIMIT_BYTES),
    )(pred2d, true2d)
    return jnp.sum(sq_p[:, 0, 0])


# --------------------------------------------------------------------------
# Public API (JAX/Pallas equivalent of Loss.forward)
# --------------------------------------------------------------------------
def dual_mse_loss(pred, true, mask=None, loss2=None, **kwargs):
    if loss2 is None:
        raise ValueError("loss2 must be provided")
    pred = jnp.asarray(pred)
    true = jnp.asarray(true)
    pred2d = _to_2d(pred)
    true2d = _to_2d(true)
    n = int(pred2d.size)

    if mask is None:
        # Specialized path: never materialize / stream a ones tensor.
        sq = _unmasked_partial_sum(pred2d, true2d)
        denom = jnp.float32(n if n > 0 else 1)
        loss = sq / denom + loss2
    else:
        mask = jnp.asarray(mask)
        if mask.shape != true.shape:
            mask = jnp.broadcast_to(mask, true.shape)
        mask2d = _to_2d(mask)
        sq, cnt = _masked_partial_sums(pred2d, true2d, mask2d)
        denom = jnp.where(cnt > 0, cnt, jnp.float32(1.0))
        loss = sq / denom + loss2
    return {"loss": loss}


# --------------------------------------------------------------------------
# Reference + self-test
# --------------------------------------------------------------------------
def _reference(pred, true, mask, loss2):
    mask = mask.astype(jnp.float32)
    residual = (pred.astype(jnp.float32) - true.astype(jnp.float32)) * mask
    num_eval = mask.sum()
    denom = jnp.where(num_eval > 0, num_eval, 1.0)
    return (residual ** 2).sum() / denom + loss2


if __name__ == "__main__":
    key = jax.random.PRNGKey(0)
    k1, k2, k3, k4, k5, k6 = jax.random.split(key, 6)

    # Small NCHW-style tensors, same axis convention as the PyTorch module.
    B, C, H, W = 2, 4, 16, 16
    pred = jax.random.normal(k1, (B, C, H, W), dtype=jnp.float32)
    true = jax.random.normal(k2, (B, C, H, W), dtype=jnp.float32)
    mask = (jax.random.uniform(k3, (B, C, H, W)) > 0.3).astype(jnp.float32)
    loss2 = jnp.float32(0.125)

    out = dual_mse_loss(pred, true, mask=mask, loss2=loss2)
    val = jax.block_until_ready(out["loss"])
    ref = _reference(pred, true, mask, loss2)
    assert jnp.allclose(val, ref, rtol=1e-5, atol=1e-5), (val, ref)

    # mask=None default path (specialized 2-input kernel).
    out2 = dual_mse_loss(pred, true, loss2=loss2)
    val2 = jax.block_until_ready(out2["loss"])
    ref2 = _reference(pred, true, jnp.ones_like(true), loss2)
    assert jnp.allclose(val2, ref2, rtol=1e-5, atol=1e-5), (val2, ref2)

    # Shape that exercises a multi-block grid with a ragged (masked) last block.
    pred3 = jax.random.normal(k4, (1000, 300), dtype=jnp.float32)
    true3 = jax.random.normal(k5, (1000, 300), dtype=jnp.float32)
    mask3 = (jax.random.uniform(k6, (1000, 300)) > 0.5).astype(jnp.float32)
    out3 = dual_mse_loss(pred3, true3, mask=mask3, loss2=jnp.float32(-0.5))
    val3 = jax.block_until_ready(out3["loss"])
    ref3 = _reference(pred3, true3, mask3, jnp.float32(-0.5))
    assert jnp.allclose(val3, ref3, rtol=1e-5, atol=1e-5), (val3, ref3)

    out4 = dual_mse_loss(pred3, true3, loss2=jnp.float32(0.0))
    val4 = jax.block_until_ready(out4["loss"])
    ref4 = _reference(pred3, true3, jnp.ones_like(true3), jnp.float32(0.0))
    assert jnp.allclose(val4, ref4, rtol=1e-5, atol=1e-5), (val4, ref4)

    print("KERNEL_OK")
</pallas_src>

<mosaic_0001>
module attributes {stable_mosaic.version = 11 : i64} {
  func.func @_masked_kernel(%arg0: i32, %arg1: memref<1x2048xf32, #tpu.memory_space<vmem>>, %arg2: memref<1x2048xf32, #tpu.memory_space<vmem>>, %arg3: memref<1x2048xf32, #tpu.memory_space<vmem>>, %arg4: memref<1x8x128xf32, #tpu.memory_space<vmem>>, %arg5: memref<1x8x128xf32, #tpu.memory_space<vmem>>) attributes {dimension_semantics = [#tpu.dimension_semantics<parallel>], iteration_bounds = array<i64: 1>, scalar_prefetch = 0 : i64, scratch_operands = 0 : i64, tpu.core_type = #tpu.core_type<tc>, window_params = [{transform_indices = @transform_0, window_bounds = array<i64: 1, 2048>}, {transform_indices = @transform_1, window_bounds = array<i64: 1, 2048>}, {transform_indices = @transform_2, window_bounds = array<i64: 1, 2048>}, {transform_indices = @transform_3, window_bounds = array<i64: 1, 8, 128>}, {transform_indices = @transform_4, window_bounds = array<i64: 1, 8, 128>}]} {
    %c0 = arith.constant 0 : index
    %c0_0 = arith.constant 0 : index
    %0 = vector.load %arg1[%c0, %c0_0] : memref<1x2048xf32, #tpu.memory_space<vmem>>, vector<1x2048xf32>
    %c0_1 = arith.constant 0 : index
    %c0_2 = arith.constant 0 : index
    %1 = vector.load %arg2[%c0_1, %c0_2] : memref<1x2048xf32, #tpu.memory_space<vmem>>, vector<1x2048xf32>
    %c0_3 = arith.constant 0 : index
    %c0_4 = arith.constant 0 : index
    %2 = vector.load %arg3[%c0_3, %c0_4] : memref<1x2048xf32, #tpu.memory_space<vmem>>, vector<1x2048xf32>
    %3 = arith.subf %0, %1 : vector<1x2048xf32>
    %4 = arith.mulf %3, %2 : vector<1x2048xf32>
    %5 = arith.mulf %4, %4 : vector<1x2048xf32>
    %6 = vector.shape_cast %5 : vector<1x2048xf32> to vector<1x1x2048xf32>
    %cst = arith.constant dense<0.000000e+00> : vector<1xf32>
    %7 = vector.multi_reduction <add>, %6, %cst [1, 2] : vector<1x1x2048xf32> to vector<1xf32>
    %8 = vector.shape_cast %7 : vector<1xf32> to vector<1x1x1xf32>
    %9 = vector.extract %8[0, 0, 0] : f32 from vector<1x1x1xf32>
    %10 = vector.broadcast %9 : f32 to vector<1x8x128xf32>
    %c0_5 = arith.constant 0 : index
    %c0_6 = arith.constant 0 : index
    %c0_7 = arith.constant 0 : index
    %11 = vector.load %arg4[%c0_5, %c0_6, %c0_7] : memref<1x8x128xf32, #tpu.memory_space<vmem>>, vector<1x8x128xf32>
    tpu.vector_store %arg4[%c0_5, %c0_6, %c0_7], %10 {strides = array<i32>} : memref<1x8x128xf32, #tpu.memory_space<vmem>>, vector<1x8x128xf32>,
    %12 = vector.shape_cast %2 : vector<1x2048xf32> to vector<1x1x2048xf32>
    %cst_8 = arith.constant dense<0.000000e+00> : vector<1xf32>
    %13 = vector.multi_reduction <add>, %12, %cst_8 [1, 2] : vector<1x1x2048xf32> to vector<1xf32>
    %14 = vector.shape_cast %13 : vector<1xf32> to vector<1x1x1xf32>
    %15 = vector.extract %14[0, 0, 0] : f32 from vector<1x1x1xf32>
    %16 = vector.broadcast %15 : f32 to vector<1x8x128xf32>
    %c0_9 = arith.constant 0 : index
    %c0_10 = arith.constant 0 : index
    %c0_11 = arith.constant 0 : index
    %17 = vector.load %arg5[%c0_9, %c0_10, %c0_11] : memref<1x8x128xf32, #tpu.memory_space<vmem>>, vector<1x8x128xf32>
    tpu.vector_store %arg5[%c0_9, %c0_10, %c0_11], %16 {strides = array<i32>} : memref<1x8x128xf32, #tpu.memory_space<vmem>>, vector<1x8x128xf32>,
    return
  }
  func.func @transform_0(%arg0: i32) -> (i32, i32) {
    %c0_i32 = arith.constant 0 : i32
    %c0_i32_0 = arith.constant 0 : i32
    return %arg0, %c0_i32 : i32, i32
  }
  func.func @transform_1(%arg0: i32) -> (i32, i32) {
    %c0_i32 = arith.constant 0 : i32
    %c0_i32_0 = arith.constant 0 : i32
    return %arg0, %c0_i32 : i32, i32
  }
  func.func @transform_2(%arg0: i32) -> (i32, i32) {
    %c0_i32 = arith.constant 0 : i32
    %c0_i32_0 = arith.constant 0 : i32
    return %arg0, %c0_i32 : i32, i32
  }
  func.func @transform_3(%arg0: i32) -> (i32, i32, i32) {
    %c0_i32 = arith.constant 0 : i32
    %c0_i32_0 = arith.constant 0 : i32
    %c0_i32_1 = arith.constant 0 : i32
    return %arg0, %c0_i32, %c0_i32_0 : i32, i32, i32
  }
  func.func @transform_4(%arg0: i32) -> (i32, i32, i32) {
    %c0_i32 = arith.constant 0 : i32
    %c0_i32_0 = arith.constant 0 : i32
    %c0_i32_1 = arith.constant 0 : i32
    return %arg0, %c0_i32, %c0_i32_0 : i32, i32, i32
  }
}

</mosaic_0001>

<bundles_post_ra>
// kernel: _masked_partial_sums.1
= control target key start
LH: loop header
LB: loop body
LE: loop exit
PB: predicated region body
PF: predicated region fallthrough
CT: control target
= control target key end

     0   :  { %10 = vsyncpa [#allocation3], 0  ;;  %s581_s0 = inlined_call_operand.hbm [shape: f32[1,2048], index: 0, kind: input, shape index: {}]   ;;  %s582_s1 = inlined_call_operand.hbm [shape: f32[1,2048], index: 1, kind: input, shape index: {}]   ;;  %s583_s2 = inlined_call_operand.hbm [shape: f32[1,2048], index: 2, kind: input, shape index: {}]   ;;  %s584_s3 = inlined_call_operand.vmem [shape: f32[1,8,128], index: 3, kind: output, shape index: {0}]   ;;  %s585_s4 = inlined_call_operand.vmem [shape: f32[1,8,128], index: 4, kind: output, shape index: {1}]  }
   0x1   :  { %11 = vsyncpa [#allocation5], 0  ;;  %s399_s15 = smov [#allocation4]   ;;  %s400_s17 = smov [#allocation2]  }
   0x2   :  { %s28_s16 = sshll.u32 %s399_s15, 4  ;;  %s18_s18 = sshll.u32 %s400_s17, 4  ;;  %s29_s16 = int_to_ptr.vmem [resolvable:$true] %s28_s16  ;;  %s19_s18 = int_to_ptr.vmem [resolvable:$true] %s18_s18 }
   0x3   :  { %s329_s21 = scalar_lea.hbm %s582_s1, 256 }
   0x4   :  { %p330_p0 = scmp.ne.s32.totalorder %s582_s1, %s329_s21  ;;  %p333_p1 = scmp.lt.u32.totalorder %s329_s21, %s582_s1 }
   0x6   :  { %p335_p2 = pnand %p333_p1, %p330_p0 }
   0x8   :  { %338 = shalt.err (!%p335_p2)
}
   0x9   :  { %s339_s26 = scalar_lea.vmem %s29_s16, 256  ;;  %p344_p4 = scmp.lt.s32.totalorder %s29_s16, %s29_s16 }
   0xa   :  { %p340_p3 = scmp.ne.s32.totalorder %s29_s16, %s339_s26  ;;  %p345_p5 = scmp.lt.s32.totalorder %s339_s26, %s339_s26 }
   0xc   :  { %p346_p6 = por %p345_p5, %p344_p4 }
   0xe   :  { %p347_p7 = pnand %p346_p6, %p340_p3 }
  0x10   :  { %350 = shalt.err (!%p347_p7)
}
  0x11   :  { %31 = dma.hbm_to_vmem [thread:$0]  %s582_s1, 256, %s29_s16, [#allocation5]  }
  0x12   :  { %s351_s5 = scalar_lea.hbm %s581_s0, 256 }
  0x13   :  { %p352_p8 = scmp.ne.s32.totalorder %s581_s0, %s351_s5  ;;  %p355_p9 = scmp.lt.u32.totalorder %s351_s5, %s581_s0 }
  0x15   :  { %p357_p10 = pnand %p355_p9, %p352_p8 }
  0x17   :  { %360 = shalt.err (!%p357_p10)
}
  0x18   :  { %s361_s10 = scalar_lea.vmem %s19_s18, 256  ;;  %p366_p12 = scmp.lt.s32.totalorder %s19_s18, %s19_s18 }
  0x19   :  { %p362_p11 = scmp.ne.s32.totalorder %s19_s18, %s361_s10  ;;  %p367_p13 = scmp.lt.s32.totalorder %s361_s10, %s361_s10 }
  0x1b   :  { %p368_p0 = por %p367_p13, %p366_p12 }
  0x1d   :  { %p369_p1 = pnand %p368_p0, %p362_p11 }
  0x1f   :  { %372 = shalt.err (!%p369_p1)
}
  0x20   :  { %21 = dma.hbm_to_vmem [thread:$0]  %s581_s0, 256, %s19_s18, [#allocation3]  }
  0x21   :  { %s401_s12 = smov [#allocation6]   ;;  %s373_s16 = scalar_lea.hbm %s583_s2, 256 }
  0x22   :  { %s38_s13 = sshll.u32 %s401_s12, 4  ;;  %p374_p2 = scmp.ne.s32.totalorder %s583_s2, %s373_s16  ;;  %s39_s13 = int_to_ptr.vmem [resolvable:$true] %s38_s13 }
  0x23   :  { %p377_p3 = scmp.lt.u32.totalorder %s373_s16, %s583_s2 }
  0x25   :  { %p379_p4 = pnand %p377_p3, %p374_p2 }
  0x27   :  { %382 = shalt.err (!%p379_p4)
}
  0x28   :  { %s383_s22 = scalar_lea.vmem %s39_s13, 256  ;;  %p388_p6 = scmp.lt.s32.totalorder %s39_s13, %s39_s13 }
  0x29   :  { %p384_p5 = scmp.ne.s32.totalorder %s39_s13, %s383_s22  ;;  %p389_p7 = scmp.lt.s32.totalorder %s383_s22, %s383_s22 }
  0x2b   :  { %p390_p8 = por %p389_p7, %p388_p6 }
  0x2d   :  { %p391_p9 = pnand %p390_p8, %p384_p5 }
  0x2f   :  { %394 = shalt.err (!%p391_p9)
}
  0x30   :  { %41 = dma.hbm_to_vmem [thread:$0]  %s583_s2, 256, %s39_s13, [#allocation5]  }
  0x31   :  { %395 = dma.done.wait [#allocation3], 256  }
  0x32   :  { %396 = vsyncadd [#allocation3], 4294967040 }
  0x33   :  { %397 = dma.done.wait [#allocation5], 512  }
  0x34   :  { %398 = vsyncadd [#allocation5], 4294966784  ;;  %v65_v0 = vlaneseq  ;;  %v51_v2 = vld [vmem:[#allocation2] sm:$0xff]  ;;  %v53_v3 = vld [vmem:[#allocation4] sm:$0xff]  ;;  %vm145_vm0 = vcmask 1040384  }
  0x35   :  { %v463_v4 = vld [vmem:[#allocation6] sm:$0xff]  ;;  %v57_v5 = vsub.f32 %v51_v2, %v53_v3  ;;  %v52_v6 = vld [vmem:[#allocation2 + $0x8] sm:$0xff]  ;;  %v54_v7 = vld [vmem:[#allocation4 + $0x8] sm:$0xff] }
  0x36   :  { %v66_v1 = vshrl.u32 %v65_v0, 7  ;;  %v58_v14 = vsub.f32 %v52_v6, %v54_v7  ;;  %v474_v15 = vld [vmem:[#allocation6 + $0x8] sm:$0xff] }
  0x37   :  { %v59_v8 = vmul.f32 %v57_v5, %v463_v4 }
  0x38   :  { %v466_v9 = vsub.s32 0, %v66_v1  ;;  %v468_v10 = vsub.s32 1, %v66_v1  ;;  %v470_v11 = vsub.s32 2, %v66_v1  ;;  %v472_v13 = vsub.s32 3, %v66_v1 }
  0x39   :  { %v61_v12 = vmul.f32 %v59_v8, %v59_v8  ;;  %v479_v19 = vsub.s32 4, %v66_v1  ;;  %v482_v21 = vsub.s32 5, %v66_v1  ;;  %v60_v22 = vmul.f32 %v58_v14, %v474_v15 }
  0x3a   :  { %v485_v23 = vsub.s32 6, %v66_v1  ;;  %v193_v24 = vrot.slane %v463_v4, %v466_v9  ;;  %v197_v30 = vrot.slane %v463_v4, %v468_v10  ;;  %v201_v31 = vrot.slane %v463_v4, %v470_v11 }
  0x3b   :  { %v68_v16 = vrot.slane %v61_v12, %v466_v9  ;;  %v72_v17 = vrot.slane %v61_v12, %v468_v10  ;;  %v76_v18 = vrot.slane %v61_v12, %v470_v11  ;;  %v80_v20 = vrot.slane %v61_v12, %v472_v13 }
  0x3c   :  { %v84_v25 = vrot.slane %v61_v12, %v479_v19  ;;  %v88_v32 = vrot.slane %v61_v12, %v482_v21  ;;  %v498_v33 = vsub.s32 7, %v66_v1  ;;  %v205_v36 = vrot.slane %v463_v4, %v472_v13 }
  0x3d   :  { %v146_v26 = vsel %vm145_vm0, %v68_v16, 0.0  ;;  %v147_v27 = vsel %vm145_vm0, %v72_v17, 0.0  ;;  %v149_v28 = vsel %vm145_vm0, %v76_v18, 0.0  ;;  %v151_v34 = vsel %vm145_vm0, %v80_v20, 0.0 }
  0x3e   :  { %v148_v29 = vadd.f32 %v147_v27, %v146_v26  ;;  %v503_v37 = vmul.f32 %v60_v22, %v60_v22  ;;  %v92_v38 = vrot.slane %v61_v12, %v485_v23  ;;  %v153_v39 = vsel %vm145_vm0, %v84_v25, 0.0 }
  0x3f   :  { %v270_v40 = vsel %vm145_vm0, %v193_v24, 0.0  ;;  %v209_v42 = vrot.slane %v463_v4, %v479_v19  ;;  %v271_v43 = vsel %vm145_vm0, %v197_v30, 0.0  ;;  %v273_v44 = vsel %vm145_vm0, %v201_v31, 0.0 }
  0x40   :  { %v150_v35 = vadd.f32 %v149_v28, %v148_v29  ;;  %v96_v45 = vrot.slane %v61_v12, %v498_v33  ;;  %v155_v46 = vsel %vm145_vm0, %v88_v32, 0.0  ;;  %v272_v47 = vadd.f32 %v271_v43, %v270_v40 }
  0x41   :  { %v213_v49 = vrot.slane %v463_v4, %v482_v21  ;;  %v275_v50 = vsel %vm145_vm0, %v205_v36, 0.0  ;;  %v100_v51 = vrot.slane %v503_v37, %v466_v9  ;;  %v157_v52 = vsel %vm145_vm0, %v92_v38, 0.0 }
  0x42   :  { %v152_v41 = vadd.f32 %v151_v34, %v150_v35  ;;  %v274_v53 = vadd.f32 %v273_v44, %v272_v47  ;;  %v217_v55 = vrot.slane %v463_v4, %v485_v23  ;;  %v277_v56 = vsel %vm145_vm0, %v209_v42, 0.0 }
  0x43   :  { %v104_v57 = vrot.slane %v503_v37, %v468_v10  ;;  %v159_v58 = vsel %vm145_vm0, %v96_v45, 0.0  ;;  %v221_v61 = vrot.slane %v463_v4, %v498_v33  ;;  %v279_v62 = vsel %vm145_vm0, %v213_v49, 0.0 }
  0x44   :  { %v154_v48 = vadd.f32 %v153_v39, %v152_v41  ;;  %v276_v59 = vadd.f32 %v275_v50, %v274_v53  ;;  %v108_v63 = vrot.slane %v503_v37, %v470_v11  ;;  %v161_v0 = vsel %vm145_vm0, %v100_v51, 0.0 }
  0x45   :  { %v225_v3 = vrot.slane %v474_v15, %v466_v9  ;;  %v281_v5 = vsel %vm145_vm0, %v217_v55, 0.0  ;;  %v112_v6 = vrot.slane %v503_v37, %v472_v13  ;;  %v163_v7 = vsel %vm145_vm0, %v104_v57, 0.0 }
  0x46   :  { %v156_v54 = vadd.f32 %v155_v46, %v154_v48  ;;  %v278_v1 = vadd.f32 %v277_v56, %v276_v59  ;;  %v229_v12 = vrot.slane %v474_v15, %v468_v10  ;;  %v283_v14 = vsel %vm145_vm0, %v221_v61, 0.0 }
  0x47   :  { %v116_v16 = vrot.slane %v503_v37, %v479_v19  ;;  %v165_v17 = vsel %vm145_vm0, %v108_v63, 0.0  ;;  %v233_v20 = vrot.slane %v474_v15, %v470_v11  ;;  %v285_v22 = vsel %vm145_vm0, %v225_v3, 0.0 }
  0x48   :  { %v158_v60 = vadd.f32 %v157_v52, %v156_v54  ;;  %v280_v4 = vadd.f32 %v279_v62, %v278_v1  ;;  %v120_v24 = vrot.slane %v503_v37, %v482_v21  ;;  %v167_v25 = vsel %vm145_vm0, %v112_v6, 0.0 }
  0x49   :  { %v237_v27 = vrot.slane %v474_v15, %v472_v13  ;;  %v287_v28 = vsel %vm145_vm0, %v229_v12, 0.0  ;;  %v124_v29 = vrot.slane %v503_v37, %v485_v23  ;;  %v169_v30 = vsel %vm145_vm0, %v116_v16, 0.0 }
  0x4a   :  { %v160_v2 = vadd.f32 %v159_v58, %v158_v60  ;;  %v282_v9 = vadd.f32 %v281_v5, %v280_v4  ;;  %v241_v32 = vrot.slane %v474_v15, %v479_v19  ;;  %v289_v34 = vsel %vm145_vm0, %v233_v20, 0.0 }
  0x4b   :  { %v128_v35 = vrot.slane %v503_v37, %v498_v33  ;;  %v171_v36 = vsel %vm145_vm0, %v120_v24, 0.0  ;;  %v245_v39 = vrot.slane %v474_v15, %v482_v21  ;;  %v291_v40 = vsel %vm145_vm0, %v237_v27, 0.0 }
  0x4c   :  { %v162_v8 = vadd.f32 %v161_v0, %v160_v2  ;;  %v284_v10 = vadd.f32 %v283_v14, %v282_v9  ;;  %v173_v41 = vsel %vm145_vm0, %v124_v29, 0.0  ;;  %v249_v19 = vrot.slane %v474_v15, %v485_v23 }
  0x4d   :  { %v293_v44 = vsel %vm145_vm0, %v241_v32, 0.0  ;;  %v175_v37 = vsel %vm145_vm0, %v128_v35, 0.0  ;;  %v253_v47 = vrot.slane %v474_v15, %v498_v33  ;;  %v295_v21 = vsel %vm145_vm0, %v245_v39, 0.0 }
  0x4e   :  { %v164_v18 = vadd.f32 %v163_v7, %v162_v8  ;;  %v286_v11 = vadd.f32 %v285_v22, %v284_v10  ;;  %v297_v50 = vsel %vm145_vm0, %v249_v19, 0.0 }
  0x4f   :  { %v299_v52 = vsel %vm145_vm0, %v253_v47, 0.0 }
  0x50   :  { %v166_v26 = vadd.f32 %v165_v17, %v164_v18  ;;  %v288_v13 = vadd.f32 %v287_v28, %v286_v11 }
  0x52   :  { %v168_v31 = vadd.f32 %v167_v25, %v166_v26  ;;  %v290_v42 = vadd.f32 %v289_v34, %v288_v13 }
  0x54   :  { %v170_v38 = vadd.f32 %v169_v30, %v168_v31  ;;  %v292_v45 = vadd.f32 %v291_v40, %v290_v42 }
  0x56   :  { %v172_v43 = vadd.f32 %v171_v36, %v170_v38  ;;  %v294_v48 = vadd.f32 %v293_v44, %v292_v45 }
  0x58   :  { %v174_v46 = vadd.f32 %v173_v41, %v172_v43  ;;  %v296_v51 = vadd.f32 %v295_v21, %v294_v48 }
  0x5a   :  { %v176_v49 = vadd.f32 %v175_v37, %v174_v46  ;;  %v298_v23 = vadd.f32 %v297_v50, %v296_v51 }
  0x5c   :  { %177 = vadd.xlane.f32.xlu0 %v176_v49  ;;  %v300_v53 = vadd.f32 %v299_v52, %v298_v23 }
  0x60   :  { %301 = vadd.xlane.f32.xlu0 %v300_v53 }
  0xe9   :  { %v178_v54 = vpop.xlane.xlu0 %177 }
  0xea   :  { %v179_v55 = vrot.slane %v178_v54, 4 }
  0xec   :  { %v180_v56 = vadd.f32 %v179_v55, %v178_v54 }
  0xed   :  { %v302_v58 = vpop.xlane.xlu0 %301 }
  0xee   :  { %v181_v57 = vrot.slane %v180_v56, 2  ;;  %v303_v59 = vrot.slane %v302_v58, 4 }
  0xf0   :  { %v182_v15 = vadd.f32 %v181_v57, %v180_v56  ;;  %v304_v33 = vadd.f32 %v303_v59, %v302_v58 }
  0xf2   :  { %v183_v60 = vrot.slane %v182_v15, 1  ;;  %v305_v61 = vrot.slane %v304_v33, 2 }
  0xf4   :  { %v184_v62 = vadd.f32 %v183_v60, %v182_v15  ;;  %v306_v63 = vadd.f32 %v305_v61, %v304_v33 }
  0xf6   :  { %322 = vpush %v184_v62  ;;  %v307_v0 = vrot.slane %v306_v63, 1 }
  0xf8   :  { %v308_v1 = vadd.f32 %v307_v0, %v306_v63 }
  0xfa   :  { %324 = vpush %v308_v1 }
 0x127   :  { %s323_s2 = spop %322 }
 0x128   :  { %v186_v2 = vstv %s323_s2 }
 0x129   :  { %187 = vst [vmem:[%s584_s3] sm:$0xff] %v186_v2 }
 0x12b   :  { %s325_s25 = spop %324 }
 0x12c   :  { %v310_v3 = vstv %s325_s25 }
 0x12d   :  { %311 = vst [vmem:[%s585_s4] sm:$0xff] %v310_v3 }
 0x12e   :  { %320 = vsyncpa [#allocation3], 1 }
 0x12f   :  { %321 = vsyncpa [#allocation5], 1 }

</bundles_post_ra>
